<compile_context>
chip_gen: v5e
topology: v5e:2x2
jax: 0.10.0
libtpu: 0.0.40
codegen_flags: <defaults>
</compile_context>

<pallas_src>
import jax
import jax.numpy as jnp
from jax.experimental import pallas as pl
from jax.experimental.pallas import tpu as pltpu

PADDING_TOKEN = 0


def _round_up(x, m):
    return ((x + m - 1) // m) * m


def rnn_last_hidden_kernel(last_ref, xw_ref, whhT_ref, hlast_ref):
    """Single kernel invocation: runs the full RNN recurrence in VMEM.

    last_ref : (Bp, 1) int32   per-row (length - 1); -1 for padded batch rows
    xw_ref   : (T, Bp, Hp) f32 precomputed x_t @ W_ih^T, time-major
    whhT_ref : (Hp, Hp) f32    W_hh^T (pre-transposed in the wrapper)
    hlast_ref: (Bp, Hp) f32    hidden state captured at step == length - 1
    """
    T = xw_ref.shape[0]
    whhT = whhT_ref[...]          # resident across the whole loop
    last = last_ref[...]          # (Bp, 1), loaded once

    def step(t, carry):
        h, out = carry
        # h_t = tanh(x_t @ W_ih^T + h_{t-1} @ W_hh^T)   (bias=False)
        h = jnp.tanh(xw_ref[t]
                     + jnp.dot(h, whhT, preferred_element_type=jnp.float32))
        out = jnp.where(last == t, h, out)   # capture h at step == length - 1
        return h, out

    zeros = jnp.zeros(hlast_ref.shape, jnp.float32)
    _, out = jax.lax.fori_loop(0, T, step, (zeros, zeros), unroll=True)
    hlast_ref[...] = out


def sentiment_forward(batch_reviews, batch_lengths, params):
    """batch_reviews: (B, T) int32 token ids; batch_lengths: (B,) int32 (>= 1)."""
    emb = params["embedding"]          # (V, E), row PADDING_TOKEN is zero
    w_ih = params["w_ih"]              # (H, E)
    w_hh = params["w_hh"]              # (H, H)
    w_cls = params["w_cls"]            # (2, H)
    b_cls = params["b_cls"]            # (2,)

    B, T = batch_reviews.shape
    H = w_hh.shape[0]

    # Pad batch to sublane multiple (8) and hidden to lane multiple (128) for the kernel.
    Bp = _round_up(max(B, 8), 8)
    Hp = _round_up(max(H, 128), 128)

    # Glue (plain JAX / XLA): embedding gather + hoisted input projection as ONE big matmul.
    data = jnp.take(emb, batch_reviews, axis=0)                 # (B, T, E)
    xw = jnp.einsum("bte,he->bth", data, w_ih)                  # (B, T, H) == x @ W_ih^T
    xw_tm = jnp.transpose(xw, (1, 0, 2)).astype(jnp.float32)    # (T, B, H) time-major

    # Zero-pad to TPU-native tile sizes (padding rows/cols stay exactly zero through tanh).
    xw_p = jnp.zeros((T, Bp, Hp), jnp.float32).at[:, :B, :H].set(xw_tm)
    whhT_p = jnp.zeros((Hp, Hp), jnp.float32).at[:H, :H].set(w_hh.T.astype(jnp.float32))

    last = batch_lengths.astype(jnp.int32) - 1
    last_p = jnp.full((Bp, 1), -1, jnp.int32).at[:B, 0].set(last)   # -1: pad rows never match

    h_last = pl.pallas_call(
        rnn_last_hidden_kernel,
        out_shape=jax.ShapeDtypeStruct((Bp, Hp), jnp.float32),
        grid=(1,),
        in_specs=[
            pl.BlockSpec((Bp, 1), lambda i: (0, 0)),        # lengths - 1
            pl.BlockSpec((T, Bp, Hp), lambda i: (0, 0, 0)),  # precomputed x @ W_ih^T
            pl.BlockSpec((Hp, Hp), lambda i: (0, 0)),        # W_hh^T
        ],
        out_specs=pl.BlockSpec((Bp, Hp), lambda i: (0, 0)),
        compiler_params=pltpu.CompilerParams(
            dimension_semantics=("arbitrary",)),
    )(last_p, xw_p, whhT_p)

    # Lane-dense kernel output; tiny 2-class projection done outside the kernel.
    h_last = h_last[:B, :H]
    logits = h_last @ w_cls.T.astype(jnp.float32) + b_cls.astype(jnp.float32)
    return logits


def reference_forward(batch_reviews, batch_lengths, params):
    """Pure-JAX reference mirroring the PyTorch forward."""
    emb = params["embedding"]
    w_ih, w_hh = params["w_ih"], params["w_hh"]
    w_cls, b_cls = params["w_cls"], params["b_cls"]
    data = jnp.take(emb, batch_reviews, axis=0)          # (B, T, E)
    B, T, _ = data.shape
    H = w_hh.shape[0]

    def step(h, x_t):
        h_new = jnp.tanh(x_t @ w_ih.T + h @ w_hh.T)
        return h_new, h_new

    _, hs = jax.lax.scan(step, jnp.zeros((B, H), jnp.float32),
                         jnp.transpose(data, (1, 0, 2)))
    hs = jnp.transpose(hs, (1, 0, 2))                    # (B, T, H)
    outputs = hs[jnp.arange(B), batch_lengths - 1, :]
    return outputs @ w_cls.T + b_cls


def make_params(key, vocab_size, embedding_dim, hidden_size):
    k1, k2, k3, k4, k5 = jax.random.split(key, 5)
    emb = jax.random.normal(k1, (vocab_size, embedding_dim), jnp.float32) * 0.1
    emb = emb.at[PADDING_TOKEN].set(0.0)                 # padding_idx=0
    w_ih = jax.random.normal(k2, (hidden_size, embedding_dim), jnp.float32) * 0.2
    w_hh = jax.random.normal(k3, (hidden_size, hidden_size), jnp.float32) * 0.2
    w_cls = jax.random.normal(k4, (2, hidden_size), jnp.float32) * 0.2
    b_cls = jax.random.normal(k5, (2,), jnp.float32) * 0.1
    return {"embedding": emb, "w_ih": w_ih, "w_hh": w_hh,
            "w_cls": w_cls, "b_cls": b_cls}


if __name__ == "__main__":
    VOCAB, E, H = 50, 16, 32
    B, T = 4, 8

    key = jax.random.PRNGKey(0)
    kp, kr, kl = jax.random.split(key, 3)
    params = make_params(kp, VOCAB, E, H)

    batch_reviews = jax.random.randint(kr, (B, T), 1, VOCAB, dtype=jnp.int32)
    batch_lengths = jax.random.randint(kl, (B,), 1, T + 1, dtype=jnp.int32)
    # Pad positions beyond each sequence's length with PADDING_TOKEN (as a dataloader would).
    pos = jnp.arange(T)[None, :]
    batch_reviews = jnp.where(pos < batch_lengths[:, None], batch_reviews, PADDING_TOKEN)

    logits = sentiment_forward(batch_reviews, batch_lengths, params)
    jax.block_until_ready(logits)

    ref = reference_forward(batch_reviews, batch_lengths, params)
    assert logits.shape == (B, 2)
    assert jnp.allclose(logits, ref, atol=1e-5, rtol=1e-5), (logits, ref)

    print("KERNEL_OK")
</pallas_src>

<mosaic_0001>
module attributes {stable_mosaic.version = 11 : i64} {
  func.func @rnn_last_hidden_kernel(%arg0: i32, %arg1: memref<8x1xi32, #tpu.memory_space<vmem>>, %arg2: memref<8x8x128xf32, #tpu.memory_space<vmem>>, %arg3: memref<128x128xf32, #tpu.memory_space<vmem>>, %arg4: memref<8x128xf32, #tpu.memory_space<vmem>>) attributes {dimension_semantics = [#tpu.dimension_semantics<arbitrary>], iteration_bounds = array<i64: 1>, scalar_prefetch = 0 : i64, scratch_operands = 0 : i64, tpu.core_type = #tpu.core_type<tc>, window_params = [{pipeline_mode = #tpu.pipeline_mode<synchronous>, transform_indices = @transform_0, window_bounds = array<i64: 8, 1>}, {pipeline_mode = #tpu.pipeline_mode<synchronous>, transform_indices = @transform_1, window_bounds = array<i64: 8, 8, 128>}, {pipeline_mode = #tpu.pipeline_mode<synchronous>, transform_indices = @transform_2, window_bounds = array<i64: 128, 128>}, {pipeline_mode = #tpu.pipeline_mode<synchronous>, transform_indices = @transform_3, window_bounds = array<i64: 8, 128>}]} {
    %c0 = arith.constant 0 : index
    %c0_0 = arith.constant 0 : index
    %0 = vector.load %arg3[%c0, %c0_0] : memref<128x128xf32, #tpu.memory_space<vmem>>, vector<128x128xf32>
    %c0_1 = arith.constant 0 : index
    %c0_2 = arith.constant 0 : index
    %1 = vector.load %arg1[%c0_1, %c0_2] : memref<8x1xi32, #tpu.memory_space<vmem>>, vector<8x1xi32>
    %cst = arith.constant 0.000000e+00 : f32
    %2 = vector.broadcast %cst : f32 to vector<8x128xf32>
    %c0_i32 = arith.constant 0 : i32
    %3 = arith.index_cast %c0_i32 : i32 to index
    %c0_3 = arith.constant 0 : index
    %c0_4 = arith.constant 0 : index
    %4 = vector.load %arg2[%3, %c0_3, %c0_4] : memref<8x8x128xf32, #tpu.memory_space<vmem>>, vector<1x8x128xf32>
    %5 = vector.shape_cast %4 : vector<1x8x128xf32> to vector<8x128xf32>
    %cst_5 = arith.constant dense<0.000000e+00> : vector<8x128xf32>
    %6 = tpu.matmul %2, %0, %cst_5 {dimension_numbers = #tpu.dot_dimension_numbers<[1], [0], [0], [1], [0, 0, 1, 1], [], []>} : vector<8x128xf32>, vector<128x128xf32>, vector<8x128xf32> -> vector<8x128xf32>
    %7 = arith.addf %5, %6 : vector<8x128xf32>
    %8 = math.tanh %7 : vector<8x128xf32>
    %9 = vector.broadcast %c0_i32 : i32 to vector<8x1xi32>
    %10 = arith.cmpi eq, %1, %9 : vector<8x1xi32>
    %11 = vector.shape_cast %10 : vector<8x1xi1> to vector<8x1xi1>
    %12 = vector.broadcast %11 : vector<8x1xi1> to vector<8x128xi1>
    %13 = arith.select %12, %8, %2 : vector<8x128xi1>, vector<8x128xf32>
    %c1_i32 = arith.constant 1 : i32
    %14 = arith.index_cast %c1_i32 : i32 to index
    %c0_6 = arith.constant 0 : index
    %c0_7 = arith.constant 0 : index
    %15 = vector.load %arg2[%14, %c0_6, %c0_7] : memref<8x8x128xf32, #tpu.memory_space<vmem>>, vector<1x8x128xf32>
    %16 = vector.shape_cast %15 : vector<1x8x128xf32> to vector<8x128xf32>
    %cst_8 = arith.constant dense<0.000000e+00> : vector<8x128xf32>
    %17 = tpu.matmul %8, %0, %cst_8 {dimension_numbers = #tpu.dot_dimension_numbers<[1], [0], [0], [1], [0, 0, 1, 1], [], []>} : vector<8x128xf32>, vector<128x128xf32>, vector<8x128xf32> -> vector<8x128xf32>
    %18 = arith.addf %16, %17 : vector<8x128xf32>
    %19 = math.tanh %18 : vector<8x128xf32>
    %20 = vector.broadcast %c1_i32 : i32 to vector<8x1xi32>
    %21 = arith.cmpi eq, %1, %20 : vector<8x1xi32>
    %22 = vector.shape_cast %21 : vector<8x1xi1> to vector<8x1xi1>
    %23 = vector.broadcast %22 : vector<8x1xi1> to vector<8x128xi1>
    %24 = arith.select %23, %19, %13 : vector<8x128xi1>, vector<8x128xf32>
    %c2_i32 = arith.constant 2 : i32
    %25 = arith.index_cast %c2_i32 : i32 to index
    %c0_9 = arith.constant 0 : index
    %c0_10 = arith.constant 0 : index
    %26 = vector.load %arg2[%25, %c0_9, %c0_10] : memref<8x8x128xf32, #tpu.memory_space<vmem>>, vector<1x8x128xf32>
    %27 = vector.shape_cast %26 : vector<1x8x128xf32> to vector<8x128xf32>
    %cst_11 = arith.constant dense<0.000000e+00> : vector<8x128xf32>
    %28 = tpu.matmul %19, %0, %cst_11 {dimension_numbers = #tpu.dot_dimension_numbers<[1], [0], [0], [1], [0, 0, 1, 1], [], []>} : vector<8x128xf32>, vector<128x128xf32>, vector<8x128xf32> -> vector<8x128xf32>
    %29 = arith.addf %27, %28 : vector<8x128xf32>
    %30 = math.tanh %29 : vector<8x128xf32>
    %31 = vector.broadcast %c2_i32 : i32 to vector<8x1xi32>
    %32 = arith.cmpi eq, %1, %31 : vector<8x1xi32>
    %33 = vector.shape_cast %32 : vector<8x1xi1> to vector<8x1xi1>
    %34 = vector.broadcast %33 : vector<8x1xi1> to vector<8x128xi1>
    %35 = arith.select %34, %30, %24 : vector<8x128xi1>, vector<8x128xf32>
    %c3_i32 = arith.constant 3 : i32
    %36 = arith.index_cast %c3_i32 : i32 to index
    %c0_12 = arith.constant 0 : index
    %c0_13 = arith.constant 0 : index
    %37 = vector.load %arg2[%36, %c0_12, %c0_13] : memref<8x8x128xf32, #tpu.memory_space<vmem>>, vector<1x8x128xf32>
    %38 = vector.shape_cast %37 : vector<1x8x128xf32> to vector<8x128xf32>
    %cst_14 = arith.constant dense<0.000000e+00> : vector<8x128xf32>
    %39 = tpu.matmul %30, %0, %cst_14 {dimension_numbers = #tpu.dot_dimension_numbers<[1], [0], [0], [1], [0, 0, 1, 1], [], []>} : vector<8x128xf32>, vector<128x128xf32>, vector<8x128xf32> -> vector<8x128xf32>
    %40 = arith.addf %38, %39 : vector<8x128xf32>
    %41 = math.tanh %40 : vector<8x128xf32>
    %42 = vector.broadcast %c3_i32 : i32 to vector<8x1xi32>
    %43 = arith.cmpi eq, %1, %42 : vector<8x1xi32>
    %44 = vector.shape_cast %43 : vector<8x1xi1> to vector<8x1xi1>
    %45 = vector.broadcast %44 : vector<8x1xi1> to vector<8x128xi1>
    %46 = arith.select %45, %41, %35 : vector<8x128xi1>, vector<8x128xf32>
    %c4_i32 = arith.constant 4 : i32
    %47 = arith.index_cast %c4_i32 : i32 to index
    %c0_15 = arith.constant 0 : index
    %c0_16 = arith.constant 0 : index
    %48 = vector.load %arg2[%47, %c0_15, %c0_16] : memref<8x8x128xf32, #tpu.memory_space<vmem>>, vector<1x8x128xf32>
    %49 = vector.shape_cast %48 : vector<1x8x128xf32> to vector<8x128xf32>
    %cst_17 = arith.constant dense<0.000000e+00> : vector<8x128xf32>
    %50 = tpu.matmul %41, %0, %cst_17 {dimension_numbers = #tpu.dot_dimension_numbers<[1], [0], [0], [1], [0, 0, 1, 1], [], []>} : vector<8x128xf32>, vector<128x128xf32>, vector<8x128xf32> -> vector<8x128xf32>
    %51 = arith.addf %49, %50 : vector<8x128xf32>
    %52 = math.tanh %51 : vector<8x128xf32>
    %53 = vector.broadcast %c4_i32 : i32 to vector<8x1xi32>
    %54 = arith.cmpi eq, %1, %53 : vector<8x1xi32>
    %55 = vector.shape_cast %54 : vector<8x1xi1> to vector<8x1xi1>
    %56 = vector.broadcast %55 : vector<8x1xi1> to vector<8x128xi1>
    %57 = arith.select %56, %52, %46 : vector<8x128xi1>, vector<8x128xf32>
    %c5_i32 = arith.constant 5 : i32
    %58 = arith.index_cast %c5_i32 : i32 to index
    %c0_18 = arith.constant 0 : index
    %c0_19 = arith.constant 0 : index
    %59 = vector.load %arg2[%58, %c0_18, %c0_19] : memref<8x8x128xf32, #tpu.memory_space<vmem>>, vector<1x8x128xf32>
    %60 = vector.shape_cast %59 : vector<1x8x128xf32> to vector<8x128xf32>
    %cst_20 = arith.constant dense<0.000000e+00> : vector<8x128xf32>
    %61 = tpu.matmul %52, %0, %cst_20 {dimension_numbers = #tpu.dot_dimension_numbers<[1], [0], [0], [1], [0, 0, 1, 1], [], []>} : vector<8x128xf32>, vector<128x128xf32>, vector<8x128xf32> -> vector<8x128xf32>
    %62 = arith.addf %60, %61 : vector<8x128xf32>
    %63 = math.tanh %62 : vector<8x128xf32>
    %64 = vector.broadcast %c5_i32 : i32 to vector<8x1xi32>
    %65 = arith.cmpi eq, %1, %64 : vector<8x1xi32>
    %66 = vector.shape_cast %65 : vector<8x1xi1> to vector<8x1xi1>
    %67 = vector.broadcast %66 : vector<8x1xi1> to vector<8x128xi1>
    %68 = arith.select %67, %63, %57 : vector<8x128xi1>, vector<8x128xf32>
    %c6_i32 = arith.constant 6 : i32
    %69 = arith.index_cast %c6_i32 : i32 to index
    %c0_21 = arith.constant 0 : index
    %c0_22 = arith.constant 0 : index
    %70 = vector.load %arg2[%69, %c0_21, %c0_22] : memref<8x8x128xf32, #tpu.memory_space<vmem>>, vector<1x8x128xf32>
    %71 = vector.shape_cast %70 : vector<1x8x128xf32> to vector<8x128xf32>
    %cst_23 = arith.constant dense<0.000000e+00> : vector<8x128xf32>
    %72 = tpu.matmul %63, %0, %cst_23 {dimension_numbers = #tpu.dot_dimension_numbers<[1], [0], [0], [1], [0, 0, 1, 1], [], []>} : vector<8x128xf32>, vector<128x128xf32>, vector<8x128xf32> -> vector<8x128xf32>
    %73 = arith.addf %71, %72 : vector<8x128xf32>
    %74 = math.tanh %73 : vector<8x128xf32>
    %75 = vector.broadcast %c6_i32 : i32 to vector<8x1xi32>
    %76 = arith.cmpi eq, %1, %75 : vector<8x1xi32>
    %77 = vector.shape_cast %76 : vector<8x1xi1> to vector<8x1xi1>
    %78 = vector.broadcast %77 : vector<8x1xi1> to vector<8x128xi1>
    %79 = arith.select %78, %74, %68 : vector<8x128xi1>, vector<8x128xf32>
    %c7_i32 = arith.constant 7 : i32
    %80 = arith.index_cast %c7_i32 : i32 to index
    %c0_24 = arith.constant 0 : index
    %c0_25 = arith.constant 0 : index
    %81 = vector.load %arg2[%80, %c0_24, %c0_25] : memref<8x8x128xf32, #tpu.memory_space<vmem>>, vector<1x8x128xf32>
    %82 = vector.shape_cast %81 : vector<1x8x128xf32> to vector<8x128xf32>
    %cst_26 = arith.constant dense<0.000000e+00> : vector<8x128xf32>
    %83 = tpu.matmul %74, %0, %cst_26 {dimension_numbers = #tpu.dot_dimension_numbers<[1], [0], [0], [1], [0, 0, 1, 1], [], []>} : vector<8x128xf32>, vector<128x128xf32>, vector<8x128xf32> -> vector<8x128xf32>
    %84 = arith.addf %82, %83 : vector<8x128xf32>
    %85 = math.tanh %84 : vector<8x128xf32>
    %86 = vector.broadcast %c7_i32 : i32 to vector<8x1xi32>
    %87 = arith.cmpi eq, %1, %86 : vector<8x1xi32>
    %88 = vector.shape_cast %87 : vector<8x1xi1> to vector<8x1xi1>
    %89 = vector.broadcast %88 : vector<8x1xi1> to vector<8x128xi1>
    %90 = arith.select %89, %85, %79 : vector<8x128xi1>, vector<8x128xf32>
    %c8_i32 = arith.constant 8 : i32
    %c0_27 = arith.constant 0 : index
    %c0_28 = arith.constant 0 : index
    %91 = vector.load %arg4[%c0_27, %c0_28] : memref<8x128xf32, #tpu.memory_space<vmem>>, vector<8x128xf32>
    tpu.vector_store %arg4[%c0_27, %c0_28], %90 {strides = array<i32>} : memref<8x128xf32, #tpu.memory_space<vmem>>, vector<8x128xf32>,
    return
  }
  func.func @transform_0(%arg0: i32) -> (i32, i32) {
    %c0_i32 = arith.constant 0 : i32
    %c0_i32_0 = arith.constant 0 : i32
    %c0_i32_1 = arith.constant 0 : i32
    return %c0_i32, %c0_i32_0 : i32, i32
  }
  func.func @transform_1(%arg0: i32) -> (i32, i32, i32) {
    %c0_i32 = arith.constant 0 : i32
    %c0_i32_0 = arith.constant 0 : i32
    %c0_i32_1 = arith.constant 0 : i32
    %c0_i32_2 = arith.constant 0 : i32
    return %c0_i32, %c0_i32_0, %c0_i32_1 : i32, i32, i32
  }
  func.func @transform_2(%arg0: i32) -> (i32, i32) {
    %c0_i32 = arith.constant 0 : i32
    %c0_i32_0 = arith.constant 0 : i32
    %c0_i32_1 = arith.constant 0 : i32
    return %c0_i32, %c0_i32_0 : i32, i32
  }
  func.func @transform_3(%arg0: i32) -> (i32, i32) {
    %c0_i32 = arith.constant 0 : i32
    %c0_i32_0 = arith.constant 0 : i32
    %c0_i32_1 = arith.constant 0 : i32
    return %c0_i32, %c0_i32_0 : i32, i32
  }
}

</mosaic_0001>

<bundles_post_ra>
// kernel: tpu_custom_call.1
= control target key start
LH: loop header
LB: loop body
LE: loop exit
PB: predicated region body
PF: predicated region fallthrough
CT: control target
= control target key end

     0   :  { %8 = vsyncpa [#allocation3], 0  ;;  %s654_s0 = inlined_call_operand.vmem [shape: s32[8,1], index: 0, kind: input, shape index: {}]   ;;  %s655_s1 = inlined_call_operand.hbm [shape: f32[8,8,128], index: 1, kind: input, shape index: {}]   ;;  %s656_s2 = inlined_call_operand.hbm [shape: f32[128,128], index: 2, kind: input, shape index: {}]   ;;  %s657_s3 = inlined_call_operand.hbm [shape: f32[8,128], index: 3, kind: output, shape index: {}]  }
   0x1   :  { %9 = vsyncpa [#allocation6], 0 }
   0x2   :  { %10 = vsyncpa [#allocation4], 0  ;;  %s17_s14 = sshll.u32 %s655_s1, 4  ;;  %s434_s15 = smov [#allocation2]   ;;  %s18_s14 = int_to_ptr.hbm [resolvable:$true] %s17_s14 }
   0x3   :  { %s19_s16 = sshll.u32 %s434_s15, 4  ;;  %s30_s19 = sshll.u32 %s656_s2, 4  ;;  %s20_s16 = int_to_ptr.vmem [resolvable:$true] %s19_s16  ;;  %s31_s19 = int_to_ptr.hbm [resolvable:$true] %s30_s19 }
   0x4   :  { %s435_s20 = smov 128   ;;  %s436_s21 = smov 8  }
   0x5   :  { %25 = dma.hbm_to_vmem [thread:$0]  %s18_s14, 1024, %s20_s16, [#allocation3], %s435_s20, %s435_s20, %s436_s21  }
   0x6   :  { %s437_s22 = smov [#allocation5]  }
   0x7   :  { %s32_s23 = sshll.u32 %s437_s22, 4  ;;  %s33_s23 = int_to_ptr.vmem [resolvable:$true] %s32_s23 }
   0x8   :  { %38 = dma.hbm_to_vmem [thread:$0]  %s31_s19, 2048, %s33_s23, [#allocation6], %s435_s20, %s435_s20, %s436_s21  }
   0x9   :  { %428 = dma.done.wait [#allocation3], 1024  }
   0xa   :  { %429 = vsyncadd [#allocation3], 4294966272 }
   0xb   :  { %430 = dma.done.wait [#allocation6], 2048  }
   0xc   :  { %431 = vsyncadd [#allocation6], 4294965248  ;;  %v467_v0 = vld [vmem:[#allocation5 + $0x78] sm:$0xff]  ;;  %v469_v1 = vld [vmem:[#allocation5 + $0x70] sm:$0xff]  ;;  %v438_v2 = vmov 0   ;;  %v439_v19 = vmov 0.0  }
   0xd   :  { %65 = vmatpush.msra.mxu0 %v467_v0  ;;  %337 = vset.pattern.permute.xlu0 %v438_v2  ;;  %v473_v3 = vld [vmem:[#allocation5 + $0x68] sm:$0xff]  ;;  %v479_v4 = vld [vmem:[#allocation5 + $0x60] sm:$0xff]  ;;  %v490_v6 = vld [vmem:[#allocation5 + $0x58] sm:$0xff]  ;;  %s319_s27 = sshll.u32 %s657_s3, 4  ;;  %s320_s27 = int_to_ptr.hbm [resolvable:$true] %s319_s27 }
   0xe   :  { %96 = vmatpush.msra.mxu1 %v467_v0  ;;  %127 = vmatpush.msra.mxu2 %v467_v0  ;;  %v487_v5 = vld [vmem:[%s654_s0] sm:$0xff]  ;;  %v498_v8 = vld [vmem:[#allocation5 + $0x50] sm:$0xff]  ;;  %v503_v9 = vld [vmem:[#allocation5 + $0x48] sm:$0xff]  ;;  %s440_s0 = smov [#allocation7]  }
   0xf   :  { %66 = vmatpush.msra.mxu0 %v469_v1  ;;  %338 = vset.pattern.permute.xlu1 %v438_v2  ;;  %vm87_vm0 = vcmp.eq.s32.totalorder %v487_v5, 0  ;;  %v509_v10 = vld [vmem:[#allocation5 + $0x40] sm:$0xff]  ;;  %v515_v11 = vld [vmem:[#allocation5 + $0x38] sm:$0xff]  ;;  %v521_v12 = vld [vmem:[#allocation5 + $0x30] sm:$0xff]  ;;  %vm118_vm1 = vcmp.eq.s32.totalorder %v487_v5, 1  ;;  %vm149_vm2 = vcmp.eq.s32.totalorder %v487_v5, 2 }
  0x10   :  { %97 = vmatpush.msra.mxu1 %v469_v1  ;;  %128 = vmatpush.msra.mxu2 %v469_v1  ;;  %v88_v7 = vsel %vm87_vm0, 1, %v438_v2  ;;  %v527_v13 = vld [vmem:[#allocation5 + $0x28] sm:$0xff]  ;;  %v533_v14 = vld [vmem:[#allocation5 + $0x20] sm:$0xff]  ;;  %v539_v15 = vld [vmem:[#allocation5 + $0x18] sm:$0xff]  ;;  %v119_v20 = vsel %vm118_vm1, 1, %v438_v2  ;;  %v150_v25 = vsel %vm149_vm2, 1, %v438_v2 }
  0x11   :  { %67 = vmatpush.msra.mxu0 %v473_v3  ;;  %158 = vmatpush.msra.mxu3 %v467_v0  ;;  %v545_v16 = vld [vmem:[#allocation5 + $0x10] sm:$0xff]  ;;  %v551_v17 = vld [vmem:[#allocation5 + $0x8] sm:$0xff]  ;;  %v557_v18 = vld [vmem:[#allocation5] sm:$0xff]  ;;  %vm180_vm5 = vcmp.eq.s32.totalorder %v487_v5, 3  ;;  %vm211_vm7 = vcmp.eq.s32.totalorder %v487_v5, 4  ;;  %vm242_vm9 = vcmp.eq.s32.totalorder %v487_v5, 5 }
  0x12   :  { %98 = vmatpush.msra.mxu1 %v473_v3  ;;  %129 = vmatpush.msra.mxu2 %v473_v3  ;;  %v64_v21 = vld [vmem:[#allocation2] sm:$0xff]  ;;  %v95_v27 = vld [vmem:[#allocation2 + $0x8] sm:$0xff]  ;;  %v181_v34 = vsel %vm180_vm5, 1, %v438_v2  ;;  %v126_v35 = vld [vmem:[#allocation2 + $0x10] sm:$0xff]  ;;  %v212_v41 = vsel %vm211_vm7, 1, %v438_v2  ;;  %v243_v48 = vsel %vm242_vm9, 1, %v438_v2 }
  0x13   :  { %68 = vmatpush.msra.mxu0 %v479_v4  ;;  %159 = vmatpush.msra.mxu3 %v469_v1  ;;  %v157_v42 = vld [vmem:[#allocation2 + $0x18] sm:$0xff]  ;;  %v188_v49 = vld [vmem:[#allocation2 + $0x20] sm:$0xff]  ;;  %vm273_vm11 = vcmp.eq.s32.totalorder %v487_v5, 6  ;;  %v219_v56 = vld [vmem:[#allocation2 + $0x28] sm:$0xff]  ;;  %vm304_vm13 = vcmp.eq.s32.totalorder %v487_v5, 7  ;;  %s317_s24 = sshll.u32 %s440_s0, 4  ;;  %s318_s24 = int_to_ptr.vmem [resolvable:$true] %s317_s24 }
  0x14   :  { %90 = vperm.xlu0 %337, %v88_v7   ;;  %99 = vmatpush.msra.mxu1 %v479_v4  ;;  %v274_v55 = vsel %vm273_vm11, 1, %v438_v2  ;;  %v305_v62 = vsel %vm304_vm13, 1, %v438_v2  ;;  %v250_v63 = vld [vmem:[#allocation2 + $0x30] sm:$0xff]  ;;  %v281_v7 = vld [vmem:[#allocation2 + $0x38] sm:$0xff] }
  0x15   :  { %69 = vmatpush.msra.mxu0 %v490_v6  ;;  %130 = vmatpush.msra.mxu2 %v479_v4 }
  0x16   :  { %100 = vmatpush.msra.mxu1 %v490_v6  ;;  %160 = vmatpush.msra.mxu3 %v473_v3 }
  0x17   :  { %70 = vmatpush.msra.mxu0 %v498_v8  ;;  %131 = vmatpush.msra.mxu2 %v490_v6 }
  0x18   :  { %101 = vmatpush.msra.mxu1 %v498_v8  ;;  %161 = vmatpush.msra.mxu3 %v479_v4 }
  0x19   :  { %71 = vmatpush.msra.mxu0 %v503_v9  ;;  %132 = vmatpush.msra.mxu2 %v498_v8 }
  0x1a   :  { %102 = vmatpush.msra.mxu1 %v503_v9  ;;  %162 = vmatpush.msra.mxu3 %v490_v6 }
  0x1b   :  { %72 = vmatpush.msra.mxu0 %v509_v10  ;;  %133 = vmatpush.msra.mxu2 %v503_v9 }
  0x1c   :  { %103 = vmatpush.msra.mxu1 %v509_v10  ;;  %163 = vmatpush.msra.mxu3 %v498_v8 }
  0x1d   :  { %73 = vmatpush.msra.mxu0 %v515_v11  ;;  %134 = vmatpush.msra.mxu2 %v509_v10 }
  0x1e   :  { %104 = vmatpush.msra.mxu1 %v515_v11  ;;  %164 = vmatpush.msra.mxu3 %v503_v9 }
  0x1f   :  { %74 = vmatpush.msra.mxu0 %v521_v12  ;;  %135 = vmatpush.msra.mxu2 %v515_v11 }
  0x20   :  { %105 = vmatpush.msra.mxu1 %v521_v12  ;;  %165 = vmatpush.msra.mxu3 %v509_v10 }
  0x21   :  { %75 = vmatpush.msra.mxu0 %v527_v13  ;;  %136 = vmatpush.msra.mxu2 %v521_v12 }
  0x22   :  { %106 = vmatpush.msra.mxu1 %v527_v13  ;;  %166 = vmatpush.msra.mxu3 %v515_v11 }
  0x23   :  { %76 = vmatpush.msra.mxu0 %v533_v14  ;;  %137 = vmatpush.msra.mxu2 %v527_v13 }
  0x24   :  { %107 = vmatpush.msra.mxu1 %v533_v14  ;;  %167 = vmatpush.msra.mxu3 %v521_v12 }
  0x25   :  { %77 = vmatpush.msra.mxu0 %v539_v15  ;;  %138 = vmatpush.msra.mxu2 %v533_v14 }
  0x26   :  { %108 = vmatpush.msra.mxu1 %v539_v15  ;;  %168 = vmatpush.msra.mxu3 %v527_v13 }
  0x27   :  { %78 = vmatpush.msra.mxu0 %v545_v16  ;;  %139 = vmatpush.msra.mxu2 %v539_v15 }
  0x28   :  { %109 = vmatpush.msra.mxu1 %v545_v16  ;;  %169 = vmatpush.msra.mxu3 %v533_v14 }
  0x29   :  { %79 = vmatpush.msra.mxu0 %v551_v17  ;;  %140 = vmatpush.msra.mxu2 %v545_v16 }
  0x2a   :  { %110 = vmatpush.msra.mxu1 %v551_v17  ;;  %170 = vmatpush.msra.mxu3 %v539_v15 }
  0x2b   :  { %80 = vmatpush.msra.mxu0 %v557_v18  ;;  %141 = vmatpush.msra.mxu2 %v551_v17 }
  0x2c   :  { %81 = vmatmul.f32.vlgmr.msra.gmra.mxu0 %v439_v19  ;;  %111 = vmatpush.msra.mxu1 %v557_v18 }
  0x2d   :  { %142 = vmatpush.msra.mxu2 %v557_v18  ;;  %171 = vmatpush.msra.mxu3 %v545_v16 }
  0x2e   :  { %189 = vmatpush.msrb.mxu0 %v467_v0  ;;  %339 = vset.pattern.permute.xlu2 %v438_v2 }
  0x2f   :  { %172 = vmatpush.msra.mxu3 %v551_v17  ;;  %220 = vmatpush.msrb.mxu1 %v467_v0 }
  0x30   :  { %190 = vmatpush.msrb.mxu0 %v469_v1  ;;  %251 = vmatpush.msrb.mxu2 %v467_v0 }
  0x31   :  { %173 = vmatpush.msra.mxu3 %v557_v18  ;;  %221 = vmatpush.msrb.mxu1 %v469_v1 }
  0x32   :  { %191 = vmatpush.msrb.mxu0 %v473_v3  ;;  %252 = vmatpush.msrb.mxu2 %v469_v1 }
  0x33   :  { %222 = vmatpush.msrb.mxu1 %v473_v3  ;;  %282 = vmatpush.msrb.mxu3 %v467_v0 }
  0x34   :  { %192 = vmatpush.msrb.mxu0 %v479_v4  ;;  %253 = vmatpush.msrb.mxu2 %v473_v3 }
  0x35   :  { %223 = vmatpush.msrb.mxu1 %v479_v4  ;;  %283 = vmatpush.msrb.mxu3 %v469_v1 }
  0x36   :  { %193 = vmatpush.msrb.mxu0 %v490_v6  ;;  %254 = vmatpush.msrb.mxu2 %v479_v4 }
  0x37   :  { %224 = vmatpush.msrb.mxu1 %v490_v6  ;;  %284 = vmatpush.msrb.mxu3 %v473_v3 }
  0x38   :  { %194 = vmatpush.msrb.mxu0 %v498_v8  ;;  %255 = vmatpush.msrb.mxu2 %v490_v6 }
  0x39   :  { %225 = vmatpush.msrb.mxu1 %v498_v8  ;;  %285 = vmatpush.msrb.mxu3 %v479_v4 }
  0x3a   :  { %195 = vmatpush.msrb.mxu0 %v503_v9  ;;  %256 = vmatpush.msrb.mxu2 %v498_v8 }
  0x3b   :  { %226 = vmatpush.msrb.mxu1 %v503_v9  ;;  %286 = vmatpush.msrb.mxu3 %v490_v6 }
  0x3c   :  { %196 = vmatpush.msrb.mxu0 %v509_v10  ;;  %257 = vmatpush.msrb.mxu2 %v503_v9 }
  0x3d   :  { %227 = vmatpush.msrb.mxu1 %v509_v10  ;;  %287 = vmatpush.msrb.mxu3 %v498_v8 }
  0x3e   :  { %197 = vmatpush.msrb.mxu0 %v515_v11  ;;  %258 = vmatpush.msrb.mxu2 %v509_v10 }
  0x3f   :  { %228 = vmatpush.msrb.mxu1 %v515_v11  ;;  %288 = vmatpush.msrb.mxu3 %v503_v9 }
  0x40   :  { %198 = vmatpush.msrb.mxu0 %v521_v12  ;;  %259 = vmatpush.msrb.mxu2 %v515_v11 }
  0x41   :  { %229 = vmatpush.msrb.mxu1 %v521_v12  ;;  %289 = vmatpush.msrb.mxu3 %v509_v10 }
  0x42   :  { %199 = vmatpush.msrb.mxu0 %v527_v13  ;;  %260 = vmatpush.msrb.mxu2 %v521_v12 }
  0x43   :  { %230 = vmatpush.msrb.mxu1 %v527_v13  ;;  %290 = vmatpush.msrb.mxu3 %v515_v11 }
  0x44   :  { %200 = vmatpush.msrb.mxu0 %v533_v14  ;;  %261 = vmatpush.msrb.mxu2 %v527_v13 }
  0x45   :  { %231 = vmatpush.msrb.mxu1 %v533_v14  ;;  %291 = vmatpush.msrb.mxu3 %v521_v12 }
  0x46   :  { %201 = vmatpush.msrb.mxu0 %v539_v15  ;;  %262 = vmatpush.msrb.mxu2 %v533_v14 }
  0x47   :  { %232 = vmatpush.msrb.mxu1 %v539_v15  ;;  %292 = vmatpush.msrb.mxu3 %v527_v13 }
  0x48   :  { %202 = vmatpush.msrb.mxu0 %v545_v16  ;;  %263 = vmatpush.msrb.mxu2 %v539_v15 }
  0x49   :  { %233 = vmatpush.msrb.mxu1 %v545_v16  ;;  %293 = vmatpush.msrb.mxu3 %v533_v14 }
  0x4a   :  { %203 = vmatpush.msrb.mxu0 %v551_v17  ;;  %264 = vmatpush.msrb.mxu2 %v545_v16 }
  0x4b   :  { %234 = vmatpush.msrb.mxu1 %v551_v17  ;;  %294 = vmatpush.msrb.mxu3 %v539_v15 }
  0x4c   :  { %204 = vmatpush.msrb.mxu0 %v557_v18  ;;  %265 = vmatpush.msrb.mxu2 %v551_v17 }
  0x4d   :  { %235 = vmatpush.msrb.mxu1 %v557_v18  ;;  %295 = vmatpush.msrb.mxu3 %v545_v16 }
  0x4e   :  { %266 = vmatpush.msrb.mxu2 %v557_v18  ;;  %121 = vperm.xlu0 %337, %v119_v20  }
  0x4f   :  { %296 = vmatpush.msrb.mxu3 %v551_v17  ;;  %152 = vperm.xlu1 %338, %v150_v25  }
  0x50   :  { %214 = vperm.xlu2 %339, %v212_v41  }
  0x51   :  { %297 = vmatpush.msrb.mxu3 %v557_v18 }
  0x56   :  { %276 = vperm.xlu0 %337, %v274_v55  }
  0x57   :  { %183 = vperm.xlu1 %338, %v181_v34  }
  0x58   :  { %245 = vperm.xlu2 %339, %v243_v48  }
  0x5f   :  { %307 = vperm.xlu1 %338, %v305_v62  }
  0x86   :  { %v91_v26 = vpop.permute.xlu0 %90 }
  0x87   :  { %vm92_vm3 = vcmp.eq.s32.totalorder %v91_v26, 1 }
  0xa9   :  { %v82_v22 = vpop.f32.mrf.mxu0 }
  0xaa   :  { %v85_v23 = vadd.f32 %v82_v22, %v64_v21  ;;  %v215_v52 = vpop.permute.xlu2 %214 }
  0xab   :  { %vm216_vm10 = vcmp.eq.s32.totalorder %v215_v52, 1 }
  0xac   :  { %340 = vtanh.f32 %v85_v23 }
  0xb2   :  { %v341_v24 = vpop.eup %340  ;;  %v246_v59 = vpop.permute.xlu2 %245 }
  0xb3   :  { %112 = vmatmul.f32.vlgmr.msra.gmra.mxu1 %v341_v24  ;;  %v93_v32 = vsel %vm92_vm3, %v341_v24, 0.0  ;;  %vm247_vm12 = vcmp.eq.s32.totalorder %v246_v59, 1 }
  0xc0   :  { %v122_v30 = vpop.permute.xlu0 %121 }
  0xc1   :  { %vm123_vm4 = vcmp.eq.s32.totalorder %v122_v30, 1  ;;  %v153_v38 = vpop.permute.xlu1 %152 }
  0xc2   :  { %vm154_vm6 = vcmp.eq.s32.totalorder %v153_v38, 1 }
  0xc8   :  { %v277_v3 = vpop.permute.xlu0 %276 }
  0xc9   :  { %v184_v45 = vpop.permute.xlu1 %183  ;;  %vm278_vm14 = vcmp.eq.s32.totalorder %v277_v3, 1 }
  0xca   :  { %vm185_vm8 = vcmp.eq.s32.totalorder %v184_v45, 1 }
  0xd1   :  { %v308_v10 = vpop.permute.xlu1 %307 }
  0xd2   :  { %vm309_vm15 = vcmp.eq.s32.totalorder %v308_v10, 1 }
 0x130   :  { %v113_v28 = vpop.f32.mrf.mxu1 }
 0x131   :  { %v116_v29 = vadd.f32 %v113_v28, %v95_v27 }
 0x133   :  { %342 = vtanh.f32 %v116_v29 }
 0x139   :  { %v343_v31 = vpop.eup %342 }
 0x13a   :  { %v124_v33 = vsel %vm123_vm4, %v343_v31, %v93_v32  ;;  %143 = vmatmul.f32.vlgmr.msra.gmra.mxu2 %v343_v31 }
 0x1bd   :  { %v144_v36 = vpop.f32.mrf.mxu2 }
 0x1be   :  { %v147_v37 = vadd.f32 %v144_v36, %v126_v35 }
 0x1c0   :  { %344 = vtanh.f32 %v147_v37 }
 0x1c6   :  { %v345_v39 = vpop.eup %344 }
 0x1c7   :  { %v155_v40 = vsel %vm154_vm6, %v345_v39, %v124_v33  ;;  %174 = vmatmul.f32.vlgmr.msra.gmra.mxu3 %v345_v39 }
 0x24a   :  { %v175_v43 = vpop.f32.mrf.mxu3 }
 0x24b   :  { %v178_v44 = vadd.f32 %v175_v43, %v157_v42 }
 0x24d   :  { %346 = vtanh.f32 %v178_v44 }
 0x253   :  { %v347_v46 = vpop.eup %346 }
 0x254   :  { %v186_v47 = vsel %vm185_vm8, %v347_v46, %v155_v40  ;;  %205 = vmatmul.f32.vlgmr.msrb.gmra.mxu0 %v347_v46 }
 0x2d1   :  { %v206_v50 = vpop.f32.mrf.mxu0 }
 0x2d2   :  { %v209_v51 = vadd.f32 %v206_v50, %v188_v49 }
 0x2d4   :  { %348 = vtanh.f32 %v209_v51 }
 0x2da   :  { %v349_v53 = vpop.eup %348 }
 0x2db   :  { %v217_v54 = vsel %vm216_vm10, %v349_v53, %v186_v47  ;;  %236 = vmatmul.f32.vlgmr.msrb.gmra.mxu1 %v349_v53 }
 0x358   :  { %v237_v57 = vpop.f32.mrf.mxu1 }
 0x359   :  { %v240_v58 = vadd.f32 %v237_v57, %v219_v56 }
 0x35b   :  { %350 = vtanh.f32 %v240_v58 }
 0x361   :  { %v351_v60 = vpop.eup %350 }
 0x362   :  { %v248_v61 = vsel %vm247_vm12, %v351_v60, %v217_v54  ;;  %267 = vmatmul.f32.vlgmr.msrb.gmra.mxu2 %v351_v60 }
 0x3e5   :  { %v268_v0 = vpop.f32.mrf.mxu2 }
 0x3e6   :  { %v271_v1 = vadd.f32 %v268_v0, %v250_v63 }
 0x3e8   :  { %352 = vtanh.f32 %v271_v1 }
 0x3ee   :  { %v353_v4 = vpop.eup %352 }
 0x3ef   :  { %v279_v6 = vsel %vm278_vm14, %v353_v4, %v248_v61  ;;  %298 = vmatmul.f32.vlgmr.msrb.gmra.mxu3 %v353_v4 }
 0x472   :  { %v299_v8 = vpop.f32.mrf.mxu3 }
 0x473   :  { %v302_v9 = vadd.f32 %v299_v8, %v281_v7 }
 0x475   :  { %354 = vtanh.f32 %v302_v9 }
 0x47b   :  { %v355_v2 = vpop.eup %354 }
 0x47c   :  { %v310_v5 = vsel %vm309_vm15, %v355_v2, %v279_v6 }
 0x47d   :  { %311 = vst [vmem:[#allocation7] sm:$0xff] %v310_v5 }
 0x47e   :  { %322 = dma.vmem_to_hbm [thread:$0]  %s318_s24, 128, %s320_s27, [#allocation4]  }
 0x47f   :  { %432 = dma.done.wait [#allocation4], 128  }
 0x480   :  { %433 = vsyncadd [#allocation4], 4294967168 }
 0x481   :  { %327 = vsyncpa [#allocation3], 1 }
 0x482   :  { %328 = vsyncpa [#allocation6], 1 }
 0x483   :  { %329 = vsyncpa [#allocation4], 1 }

</bundles_post_ra>
